<compile_context>
chip_gen: v5e
topology: v5e:2x2
jax: 0.10.0
libtpu: 0.0.40
codegen_flags: <defaults>
</compile_context>

<pallas_src>
import functools

import jax
import jax.numpy as jnp
from jax.experimental import pallas as pl
from jax.experimental.pallas import tpu as pltpu


# ---------------------------------------------------------------------------
# Kernels
# ---------------------------------------------------------------------------

def _sublane_reduce_kernel(x_ref, out_ref, mean_s, m2_s, max_s, *,
                           tr, inv_tr, inv_nm1,
                           include_mean, include_std, include_max):
    """dim=1 path: reduce over axis=1 (sublanes) of a [tb, tr, tm] block.

    Grid is (batch, M, R) with R last ("arbitrary"). Per (batch, M) output
    block, running statistics live in f32 VMEM scratch and are merged across
    R blocks (Chan/Welford merge); the output is written on the final R step.
    """
    ri = pl.program_id(2)

    @pl.when(ri == 0)
    def _init():
        mean_s[...] = jnp.zeros_like(mean_s)
        m2_s[...] = jnp.zeros_like(m2_s)
        max_s[...] = jnp.full_like(max_s, -jnp.inf)

    xb = x_ref[...]                                               # [tb, tr, tm]

    if include_mean or include_std:
        # f32 accumulation without materializing a full f32 copy for the sum.
        sum_b = jnp.sum(xb, axis=1, keepdims=True, dtype=jnp.float32)
        mean_b = sum_b * inv_tr                                   # [tb, 1, tm]
        m2_b = None
        if include_std:
            # exact two-pass within the block (d materializes f32 only here,
            # where it is needed for the subtraction anyway)
            d = xb.astype(jnp.float32) - mean_b
            m2_b = jnp.sum(d * d, axis=1, keepdims=True)          # [tb, 1, tm]
        # Chan/Welford merge of (mean_b, m2_b, n_b = tr) into the running stats.
        na = (ri * tr).astype(jnp.float32)                        # rows seen so far
        nb = float(tr)
        rb = nb / (na + nb)
        delta = mean_b - mean_s[...]
        mean_s[...] = mean_s[...] + delta * rb
        if include_std:
            m2_s[...] = m2_s[...] + m2_b + (delta * delta) * (na * rb)

    if include_max:
        mx_b = jnp.max(xb, axis=1, keepdims=True).astype(jnp.float32)
        max_s[...] = jnp.maximum(max_s[...], mx_b)

    @pl.when(ri == pl.num_programs(2) - 1)
    def _finalize():
        c = 0
        if include_mean:
            out_ref[:, c:c + 1, :] = mean_s[...].astype(out_ref.dtype)
            c += 1
        if include_std:
            # inv_nm1 is NaN for R == 1, reproducing torch.std's NaN.
            out_ref[:, c:c + 1, :] = jnp.sqrt(m2_s[...] * inv_nm1).astype(out_ref.dtype)
            c += 1
        if include_max:
            out_ref[:, c:c + 1, :] = max_s[...].astype(out_ref.dtype)
            c += 1


def _lane_reduce_kernel(x_ref, out_ref, *, inv_m, inv_mm1,
                        include_mean, include_std, include_max):
    """dim=2 path: reduce over axis=2 (lanes) of a [tb, tn, M] block.

    No wrapper-side transpose: the cross-lane reduce runs on the XLU, which has
    plenty of slack in this HBM-bound kernel. Every (batch, N) block is fully
    independent, so both grid axes are "parallel" and no accumulators are needed.
    """
    xb = x_ref[...]                                               # [tb, tn, M]
    tb, tn = xb.shape[0], xb.shape[1]

    def to_lane_row(v):  # [tb, tn, 1] -> [tb, 1, tn] for a lane-dense store
        return jnp.reshape(v, (tb, 1, tn))

    c = 0
    mean_k = None
    if include_mean or include_std:
        mean_k = jnp.sum(xb, axis=2, keepdims=True, dtype=jnp.float32) * inv_m
    if include_mean:
        out_ref[:, c:c + 1, :] = to_lane_row(mean_k).astype(out_ref.dtype)
        c += 1
    if include_std:
        d = xb.astype(jnp.float32) - mean_k
        var_k = jnp.sum(d * d, axis=2, keepdims=True) * inv_mm1   # unbiased (ddof=1)
        out_ref[:, c:c + 1, :] = to_lane_row(jnp.sqrt(var_k)).astype(out_ref.dtype)
        c += 1
    if include_max:
        mx_k = jnp.max(xb, axis=2, keepdims=True).astype(jnp.float32)
        out_ref[:, c:c + 1, :] = to_lane_row(mx_k).astype(out_ref.dtype)
        c += 1


# ---------------------------------------------------------------------------
# VMEM-budget-aware tiling
# ---------------------------------------------------------------------------

def _vmem_limit_bytes():
    """Per-call scoped VMEM limit: ~75% of physical, capped at 100 MiB.
    v5e/v6e (128 MiB physical) -> 96 MiB; v7x (64 MiB per TensorCore) -> 48 MiB."""
    phys = 64 * 1024 * 1024                    # conservative default (v7x per-TC)
    try:
        phys = int(pltpu.get_tpu_info().vmem_capacity_bytes)
    except Exception:
        pass
    return min((phys * 3) // 4, 100 * 1024 * 1024)


def _divisor_tiles(total, unit):
    """Candidate tile sizes for a dim of size `total`: divisors that are
    multiples of `unit`, plus `total` itself, descending. Exact divisors mean
    no ragged blocks and no (8,128)-layout violations by construction."""
    cands = {total}
    d = unit
    while d < total:
        if total % d == 0:
            cands.add(d)
        d += unit
    return sorted(cands, reverse=True)


def _pick_tiles_dim1(b, r, m, itemsize, n_stats, budget):
    tb_c = _divisor_tiles(b, 1)
    tm_c = _divisor_tiles(m, 128)              # lane tiles: multiples of 128 or M
    tr_c = _divisor_tiles(r, 8)                # sublane tiles: multiples of 8 or R

    def cost(tb, tm, tr):
        return (2 * tb * tr * tm * itemsize    # double-buffered input block
                + 2 * tb * n_stats * tm * 4    # double-buffered output block
                + 3 * tb * tm * 4)             # f32 scratch accumulators

    bi = mi = ri = 0
    # Shrink the reduction tile first (decouples VMEM from R), then batch, then M.
    while cost(tb_c[bi], tm_c[mi], tr_c[ri]) > budget:
        if ri + 1 < len(tr_c):
            ri += 1
        elif bi + 1 < len(tb_c):
            bi += 1
        elif mi + 1 < len(tm_c):
            mi += 1
        else:
            break
    tb, tm, tr = tb_c[bi], tm_c[mi], tr_c[ri]
    # Ensure >= 2 parallel blocks so both v7x TensorCores get work.
    if (b // tb) * (m // tm) < 2:
        if bi + 1 < len(tb_c):
            tb = tb_c[bi + 1]
        elif mi + 1 < len(tm_c):
            tm = tm_c[mi + 1]
        # else: B == 1 and M cannot be split on a 128 boundary -> single block.
    return tb, tm, tr


def _pick_tiles_dim2(b, n, m, itemsize, n_stats, budget):
    tb_c = _divisor_tiles(b, 1)
    tn_c = _divisor_tiles(n, 128)              # 128: input sublane AND output lane tiling

    def cost(tb, tn):
        return 2 * tb * tn * m * itemsize + 2 * tb * n_stats * tn * 4

    bi = ni = 0
    while cost(tb_c[bi], tn_c[ni]) > budget:
        if ni + 1 < len(tn_c):
            ni += 1
        elif bi + 1 < len(tb_c):
            bi += 1
        else:
            break
    tb, tn = tb_c[bi], tn_c[ni]
    if (b // tb) * (n // tn) < 2:
        if bi + 1 < len(tb_c):
            tb = tb_c[bi + 1]
        elif ni + 1 < len(tn_c):
            tn = tn_c[ni + 1]
    return tb, tn


# ---------------------------------------------------------------------------
# Wrapper
# ---------------------------------------------------------------------------

def pool_statistics(x, *, dim, include_mean, include_std, include_max,
                    block_budget_bytes=None):
    """Pallas forward of PoolStatistics for a batched input x: [B, N, M]."""
    assert x.ndim == 3, "expected batched [B, N, M] input"
    assert dim in (1, 2), "dim must be 1 or 2 for a [B, N, M] input"
    n_stats = int(include_mean) + int(include_std) + int(include_max)
    assert n_stats > 0, "at least one statistic must be enabled"

    b, n, m = x.shape
    itemsize = x.dtype.itemsize
    out_dtype = x.dtype

    vmem_limit = _vmem_limit_bytes()
    budget = (block_budget_bytes if block_budget_bytes is not None
              else int(vmem_limit * 0.45))

    if dim == 1:
        r, out_len = n, m                      # reduce over axis 1 (sublanes)
        inv_nm1 = 1.0 / (r - 1) if r > 1 else float("nan")   # torch.std(n=1) -> NaN
        tb, tm, tr = _pick_tiles_dim1(b, r, m, itemsize, n_stats, budget)
        grid = (b // tb, m // tm, r // tr)
        kernel = functools.partial(
            _sublane_reduce_kernel,
            tr=tr, inv_tr=1.0 / tr, inv_nm1=inv_nm1,
            include_mean=include_mean, include_std=include_std,
            include_max=include_max)
        in_specs = [pl.BlockSpec((tb, tr, tm), lambda bi, mi, ri: (bi, ri, mi))]
        out_specs = pl.BlockSpec((tb, n_stats, tm), lambda bi, mi, ri: (bi, 0, mi))
        scratch_shapes = [pltpu.VMEM((tb, 1, tm), jnp.float32)] * 3
        dim_sem = ("parallel", "parallel", "arbitrary")
    else:
        out_len = n                            # reduce over axis 2 (lanes)
        inv_mm1 = 1.0 / (m - 1) if m > 1 else float("nan")
        tb, tn = _pick_tiles_dim2(b, n, m, itemsize, n_stats, budget)
        grid = (b // tb, n // tn)
        kernel = functools.partial(
            _lane_reduce_kernel,
            inv_m=1.0 / m, inv_mm1=inv_mm1,
            include_mean=include_mean, include_std=include_std,
            include_max=include_max)
        in_specs = [pl.BlockSpec((tb, tn, m), lambda bi, ni: (bi, ni, 0))]
        out_specs = pl.BlockSpec((tb, n_stats, tn), lambda bi, ni: (bi, 0, ni))
        scratch_shapes = []
        dim_sem = ("parallel", "parallel")

    red = n if dim == 1 else m
    flops = b * red * out_len * (int(include_mean) + 4 * int(include_std)
                                 + int(include_max))
    cost = pl.CostEstimate(
        flops=max(int(flops), 1),
        transcendentals=int(include_std) * b * out_len,           # sqrt on the EUP
        bytes_accessed=int(x.size * itemsize
                           + b * n_stats * out_len * out_dtype.itemsize))

    out3 = pl.pallas_call(
        kernel,
        out_shape=jax.ShapeDtypeStruct((b, n_stats, out_len), out_dtype),
        grid_spec=pltpu.PrefetchScalarGridSpec(
            num_scalar_prefetch=0,
            grid=grid,
            in_specs=in_specs,
            out_specs=out_specs,
            scratch_shapes=scratch_shapes),
        compiler_params=pltpu.CompilerParams(
            dimension_semantics=dim_sem,
            vmem_limit_bytes=vmem_limit),
        cost_estimate=cost,
    )(x)

    # Row-major [B, n_stats, L] -> [B, n_stats*L] == torch.cat(parts, dim=1);
    # contiguous reshape, free outside the kernel.
    return out3.reshape(b, n_stats * out_len)


def reference_pool_statistics(x, *, dim, include_mean, include_std, include_max):
    """Pure-JAX reference of the same forward pass."""
    parts = []
    if include_mean:
        parts.append(jnp.mean(x, axis=dim))
    if include_std:
        parts.append(jnp.std(x, axis=dim, ddof=1))   # torch.std default: unbiased
    if include_max:
        parts.append(jnp.max(x, axis=dim))
    return jnp.concatenate(parts, axis=1)


if __name__ == "__main__":
    key = jax.random.PRNGKey(0)
    k1, k2 = jax.random.split(key)

    def check(x, dim, im, istd, imax, **kw):
        out = jax.block_until_ready(pool_statistics(
            x, dim=dim, include_mean=im, include_std=istd, include_max=imax, **kw))
        ref = reference_pool_statistics(
            x, dim=dim, include_mean=im, include_std=istd, include_max=imax)
        assert out.shape == ref.shape, (out.shape, ref.shape)
        assert jnp.allclose(out, ref, atol=1e-4, rtol=1e-4), \
            f"mismatch dim={dim} mean={im} std={istd} max={imax}"

    # dim=1 (reduce over rows / sublanes), all three statistics.
    x1 = jax.random.normal(k1, (4, 32, 128), jnp.float32)
    check(x1, 1, True, True, True)

    # dim=1 with a forced-small block budget so the R axis is tiled and the
    # Chan/Welford accumulator-merge path across grid steps is exercised.
    x2 = jax.random.normal(k2, (2, 64, 256), jnp.float32)
    check(x2, 1, True, True, True, block_budget_bytes=100_000)

    # dim=2 (reduce over columns / lanes), all three statistics — no wrapper
    # transpose; in-kernel cross-lane reduce.
    check(x1, 2, True, True, True)

    # Subset of statistics (max only) on the dim=1 path.
    check(x1, 1, False, False, True)

    print("KERNEL_OK")
</pallas_src>

<mosaic_0001>
module attributes {stable_mosaic.version = 11 : i64} {
  func.func @_sublane_reduce_kernel(%arg0: i32, %arg1: i32, %arg2: i32, %arg3: memref<2x32x128xf32, #tpu.memory_space<vmem>>, %arg4: memref<2x3x128xf32, #tpu.memory_space<vmem>>, %arg5: memref<2x1x128xf32, #tpu.memory_space<vmem>>, %arg6: memref<2x1x128xf32, #tpu.memory_space<vmem>>, %arg7: memref<2x1x128xf32, #tpu.memory_space<vmem>>) attributes {dimension_semantics = [#tpu.dimension_semantics<parallel>, #tpu.dimension_semantics<parallel>, #tpu.dimension_semantics<arbitrary>], iteration_bounds = array<i64: 2, 1, 1>, scalar_prefetch = 0 : i64, scratch_operands = 3 : i64, tpu.core_type = #tpu.core_type<tc>, window_params = [{transform_indices = @transform_0, window_bounds = array<i64: 2, 32, 128>}, {transform_indices = @transform_1, window_bounds = array<i64: 2, 3, 128>}]} {
    %c0_i32 = arith.constant 0 : i32
    %0 = arith.cmpi eq, %arg2, %c0_i32 : i32
    %1 = arith.extui %0 : i1 to i32
    %c0_i32_0 = arith.constant 0 : i32
    %2 = arith.cmpi ne, %1, %c0_i32_0 : i32
    scf.if %2 {
      %cst_31 = arith.constant 0.000000e+00 : f32
      %40 = vector.broadcast %cst_31 : f32 to vector<2x1x128xf32>
      %c0_32 = arith.constant 0 : index
      %c0_33 = arith.constant 0 : index
      %c0_34 = arith.constant 0 : index
      %41 = vector.load %arg5[%c0_32, %c0_33, %c0_34] : memref<2x1x128xf32, #tpu.memory_space<vmem>>, vector<2x1x128xf32>
      tpu.vector_store %arg5[%c0_32, %c0_33, %c0_34], %40 {strides = array<i32>} : memref<2x1x128xf32, #tpu.memory_space<vmem>>, vector<2x1x128xf32>,
      %cst_35 = arith.constant 0.000000e+00 : f32
      %42 = vector.broadcast %cst_35 : f32 to vector<2x1x128xf32>
      %c0_36 = arith.constant 0 : index
      %c0_37 = arith.constant 0 : index
      %c0_38 = arith.constant 0 : index
      %43 = vector.load %arg6[%c0_36, %c0_37, %c0_38] : memref<2x1x128xf32, #tpu.memory_space<vmem>>, vector<2x1x128xf32>
      tpu.vector_store %arg6[%c0_36, %c0_37, %c0_38], %42 {strides = array<i32>} : memref<2x1x128xf32, #tpu.memory_space<vmem>>, vector<2x1x128xf32>,
      %cst_39 = arith.constant 0xFF800000 : f32
      %44 = vector.broadcast %cst_39 : f32 to vector<2x1x128xf32>
      %c0_40 = arith.constant 0 : index
      %c0_41 = arith.constant 0 : index
      %c0_42 = arith.constant 0 : index
      %45 = vector.load %arg7[%c0_40, %c0_41, %c0_42] : memref<2x1x128xf32, #tpu.memory_space<vmem>>, vector<2x1x128xf32>
      tpu.vector_store %arg7[%c0_40, %c0_41, %c0_42], %44 {strides = array<i32>} : memref<2x1x128xf32, #tpu.memory_space<vmem>>, vector<2x1x128xf32>,
    } else {
    }
    %c0 = arith.constant 0 : index
    %c0_1 = arith.constant 0 : index
    %c0_2 = arith.constant 0 : index
    %3 = vector.load %arg3[%c0, %c0_1, %c0_2] : memref<2x32x128xf32, #tpu.memory_space<vmem>>, vector<2x32x128xf32>
    %cst = arith.constant dense<0.000000e+00> : vector<2x128xf32>
    %4 = vector.multi_reduction <add>, %3, %cst [1] : vector<2x32x128xf32> to vector<2x128xf32>
    %5 = vector.shape_cast %4 : vector<2x128xf32> to vector<2x1x128xf32>
    %cst_3 = arith.constant 3.125000e-02 : f32
    %6 = vector.broadcast %cst_3 : f32 to vector<2x1x128xf32>
    %7 = arith.mulf %5, %6 : vector<2x1x128xf32>
    %8 = vector.broadcast %7 : vector<2x1x128xf32> to vector<2x32x128xf32>
    %9 = arith.subf %3, %8 : vector<2x32x128xf32>
    %10 = arith.mulf %9, %9 : vector<2x32x128xf32>
    %cst_4 = arith.constant dense<0.000000e+00> : vector<2x128xf32>
    %11 = vector.multi_reduction <add>, %10, %cst_4 [1] : vector<2x32x128xf32> to vector<2x128xf32>
    %12 = vector.shape_cast %11 : vector<2x128xf32> to vector<2x1x128xf32>
    %c32_i32 = arith.constant 32 : i32
    %13 = arith.muli %arg2, %c32_i32 : i32
    %14 = arith.sitofp %13 : i32 to f32
    %cst_5 = arith.constant 3.200000e+01 : f32
    %15 = arith.addf %14, %cst_5 : f32
    %cst_6 = arith.constant 3.200000e+01 : f32
    %16 = arith.divf %cst_6, %15 : f32
    %c0_7 = arith.constant 0 : index
    %c0_8 = arith.constant 0 : index
    %c0_9 = arith.constant 0 : index
    %17 = vector.load %arg5[%c0_7, %c0_8, %c0_9] : memref<2x1x128xf32, #tpu.memory_space<vmem>>, vector<2x1x128xf32>
    %18 = arith.subf %7, %17 : vector<2x1x128xf32>
    %c0_10 = arith.constant 0 : index
    %c0_11 = arith.constant 0 : index
    %c0_12 = arith.constant 0 : index
    %19 = vector.load %arg5[%c0_10, %c0_11, %c0_12] : memref<2x1x128xf32, #tpu.memory_space<vmem>>, vector<2x1x128xf32>
    %20 = vector.broadcast %16 : f32 to vector<2x1x128xf32>
    %21 = arith.mulf %18, %20 : vector<2x1x128xf32>
    %22 = arith.addf %19, %21 : vector<2x1x128xf32>
    %c0_13 = arith.constant 0 : index
    %c0_14 = arith.constant 0 : index
    %c0_15 = arith.constant 0 : index
    %23 = vector.load %arg5[%c0_13, %c0_14, %c0_15] : memref<2x1x128xf32, #tpu.memory_space<vmem>>, vector<2x1x128xf32>
    tpu.vector_store %arg5[%c0_13, %c0_14, %c0_15], %22 {strides = array<i32>} : memref<2x1x128xf32, #tpu.memory_space<vmem>>, vector<2x1x128xf32>,
    %c0_16 = arith.constant 0 : index
    %c0_17 = arith.constant 0 : index
    %c0_18 = arith.constant 0 : index
    %24 = vector.load %arg6[%c0_16, %c0_17, %c0_18] : memref<2x1x128xf32, #tpu.memory_space<vmem>>, vector<2x1x128xf32>
    %25 = arith.addf %24, %12 : vector<2x1x128xf32>
    %26 = arith.mulf %18, %18 : vector<2x1x128xf32>
    %27 = arith.mulf %14, %16 : f32
    %28 = vector.broadcast %27 : f32 to vector<2x1x128xf32>
    %29 = arith.mulf %26, %28 : vector<2x1x128xf32>
    %30 = arith.addf %25, %29 : vector<2x1x128xf32>
    %c0_19 = arith.constant 0 : index
    %c0_20 = arith.constant 0 : index
    %c0_21 = arith.constant 0 : index
    %31 = vector.load %arg6[%c0_19, %c0_20, %c0_21] : memref<2x1x128xf32, #tpu.memory_space<vmem>>, vector<2x1x128xf32>
    tpu.vector_store %arg6[%c0_19, %c0_20, %c0_21], %30 {strides = array<i32>} : memref<2x1x128xf32, #tpu.memory_space<vmem>>, vector<2x1x128xf32>,
    %cst_22 = arith.constant dense<0xFF800000> : vector<2x128xf32>
    %32 = vector.multi_reduction <maximumf>, %3, %cst_22 [1] : vector<2x32x128xf32> to vector<2x128xf32>
    %33 = vector.shape_cast %32 : vector<2x128xf32> to vector<2x1x128xf32>
    %c0_23 = arith.constant 0 : index
    %c0_24 = arith.constant 0 : index
    %c0_25 = arith.constant 0 : index
    %34 = vector.load %arg7[%c0_23, %c0_24, %c0_25] : memref<2x1x128xf32, #tpu.memory_space<vmem>>, vector<2x1x128xf32>
    %35 = arith.maximumf %34, %33 : vector<2x1x128xf32>
    %c0_26 = arith.constant 0 : index
    %c0_27 = arith.constant 0 : index
    %c0_28 = arith.constant 0 : index
    %36 = vector.load %arg7[%c0_26, %c0_27, %c0_28] : memref<2x1x128xf32, #tpu.memory_space<vmem>>, vector<2x1x128xf32>
    tpu.vector_store %arg7[%c0_26, %c0_27, %c0_28], %35 {strides = array<i32>} : memref<2x1x128xf32, #tpu.memory_space<vmem>>, vector<2x1x128xf32>,
    %c0_i32_29 = arith.constant 0 : i32
    %37 = arith.cmpi eq, %arg2, %c0_i32_29 : i32
    %38 = arith.extui %37 : i1 to i32
    %c0_i32_30 = arith.constant 0 : i32
    %39 = arith.cmpi ne, %38, %c0_i32_30 : i32
    scf.if %39 {
      %c0_31 = arith.constant 0 : index
      %c0_32 = arith.constant 0 : index
      %c0_33 = arith.constant 0 : index
      %40 = vector.load %arg5[%c0_31, %c0_32, %c0_33] : memref<2x1x128xf32, #tpu.memory_space<vmem>>, vector<2x1x128xf32>
      %c0_34 = arith.constant 0 : index
      %c0_35 = arith.constant 0 : index
      %c0_36 = arith.constant 0 : index
      %41 = vector.load %arg4[%c0_34, %c0_35, %c0_36] : memref<2x3x128xf32, #tpu.memory_space<vmem>>, vector<2x1x128xf32>
      tpu.vector_store %arg4[%c0_34, %c0_35, %c0_36], %40 {strides = array<i32>} : memref<2x3x128xf32, #tpu.memory_space<vmem>>, vector<2x1x128xf32>,
      %c0_37 = arith.constant 0 : index
      %c0_38 = arith.constant 0 : index
      %c0_39 = arith.constant 0 : index
      %42 = vector.load %arg6[%c0_37, %c0_38, %c0_39] : memref<2x1x128xf32, #tpu.memory_space<vmem>>, vector<2x1x128xf32>
      %cst_40 = arith.constant 0.0322580636 : f32
      %43 = vector.broadcast %cst_40 : f32 to vector<2x1x128xf32>
      %44 = arith.mulf %42, %43 : vector<2x1x128xf32>
      %45 = math.sqrt %44 : vector<2x1x128xf32>
      %c0_41 = arith.constant 0 : index
      %c1 = arith.constant 1 : index
      %c0_42 = arith.constant 0 : index
      %46 = vector.load %arg4[%c0_41, %c1, %c0_42] : memref<2x3x128xf32, #tpu.memory_space<vmem>>, vector<2x1x128xf32>
      tpu.vector_store %arg4[%c0_41, %c1, %c0_42], %45 {strides = array<i32>} : memref<2x3x128xf32, #tpu.memory_space<vmem>>, vector<2x1x128xf32>,
      %c0_43 = arith.constant 0 : index
      %c0_44 = arith.constant 0 : index
      %c0_45 = arith.constant 0 : index
      %47 = vector.load %arg7[%c0_43, %c0_44, %c0_45] : memref<2x1x128xf32, #tpu.memory_space<vmem>>, vector<2x1x128xf32>
      %c0_46 = arith.constant 0 : index
      %c2 = arith.constant 2 : index
      %c0_47 = arith.constant 0 : index
      %48 = vector.load %arg4[%c0_46, %c2, %c0_47] : memref<2x3x128xf32, #tpu.memory_space<vmem>>, vector<2x1x128xf32>
      tpu.vector_store %arg4[%c0_46, %c2, %c0_47], %47 {strides = array<i32>} : memref<2x3x128xf32, #tpu.memory_space<vmem>>, vector<2x1x128xf32>,
    } else {
    }
    return
  }
  func.func @transform_0(%arg0: i32, %arg1: i32, %arg2: i32) -> (i32, i32, i32) {
    %c0_i32 = arith.constant 0 : i32
    return %arg0, %arg2, %arg1 : i32, i32, i32
  }
  func.func @transform_1(%arg0: i32, %arg1: i32, %arg2: i32) -> (i32, i32, i32) {
    %c0_i32 = arith.constant 0 : i32
    %c0_i32_0 = arith.constant 0 : i32
    return %arg0, %c0_i32, %arg1 : i32, i32, i32
  }
}

</mosaic_0001>

<bundles_post_ra>
// kernel: tpu_custom_call.1
= control target key start
LH: loop header
LB: loop body
LE: loop exit
PB: predicated region body
PF: predicated region fallthrough
CT: control target
= control target key end

     0   :  { %6 = vsyncpa [#allocation6], 0  ;;  %s738_s0 = inlined_call_operand.hbm [shape: f32[4,32,128], index: 0, kind: input, shape index: {}]   ;;  %s739_s1 = inlined_call_operand.vmem [shape: f32[4,3,128], index: 1, kind: output, shape index: {}]  }
   0x1   :  { %8 = vsyncpa [#allocation6 + $0x1], 0  ;;  %s633_s6 = smov 0   ;;  %s635_s7 = smov 0  }
   0x2   :  { %s637_s8 = smov 0   ;;  %s639_s9 = smov 0  }
   0x3   :  { %s641_s10 = smov 0   ;;  %s643_s11 = smov 0  }
   0x4 LB: > { %s452_s12 = sadd.s32 4294967295, %s616_s11   ;;  %s33_s13 = sadd.s32 1, %s612_s10  ;;  %s616_s11 = sphi %s643_s11, %s14_s11   ;;  %s612_s10 = sphi %s641_s10, %s746_s10   ;;  %s608_s9 = sphi %s639_s9, %s745_s9   ;;  %s604_s8 = sphi %s637_s8, %s744_s8   ;;  %s600_s7 = sphi %s635_s7, %s743_s7   ;;  %s596_s6 = sphi %s633_s6, %s742_s6  }
   0x5   : > { %p35_p0 = scmp.ge.s32.totalorder %s33_s13, 2  ;;  %s44_s14 = sadd.s32 1, %s604_s8 }
   0x6   : > { %p51_p1 = scmp.ne.s32.totalorder %s604_s8, %s600_s7  ;;  %p52_p2 = scmp.eq.s32.totalorder %s616_s11, 0 }
   0x7   : > { %s748_s13 = smov (%p35_p0, %s33_s13), 0  ;;  %p57_p4 = scmp.ne.s32.totalorder %s600_s7, %s596_s6 }
   0x8   : > { %p669_p3 = por %p52_p2, %p51_p1  ;;  %s37_s16 = ssub.s32 %s612_s10, %s748_s13 }
   0x9   : > { %p58_p5 = scmp.eq.s32.totalorder %s452_s12, 0  ;;  %p42_p6 = scmp.eq.s32.totalorder %s37_s16, 0 }
   0xa   : > { %p476_p8 = scmp.lt.s32.totalorder %s616_s11, 2  ;;  %s109_s19 = sand.u32 1, %s604_s8  }
   0xb   : > { %p676_p7 = por %p58_p5, %p57_p4  ;;  %s467_s20 = sshll.u32 %s612_s10, 6 }
   0xc   : > { %s682_s18 = scalar_select %p42_p6, %s604_s8, %s44_s14  }
   0xd   : > { %s456_s21 = sshll.u32 %s109_s19, 6  ;;  %s122_s24 = scalar_lea.hbm %s738_s0, %s467_s20 }
   0xe   : > { %s123_s25 = sshll.u32 %s122_s24, 4  ;;  %s113_s26 = scalar_lea.vmem [#allocation5], %s456_s21  ;;  %s124_s25 = int_to_ptr.hbm [resolvable:$true] %s123_s25 }
   0xf   : > { %s125_s27 = sshll.u32 %s113_s26, 4  ;;  %p473_p9 = pnand %p476_p8, %p669_p3  ;;  %s126_s27 = int_to_ptr.vmem [resolvable:$true] %s125_s27 }
  0x10   : > { %p460_p10 = scmp.ge.s32.totalorder %s616_s11, 1  ;;  %p133_p11 = scmp.lt.s32.totalorder %s616_s11, 3 }
  0x11   : > { %s110_s28 = scalar_lea.sflag [#allocation6], %s109_s19  ;;  %s618_s29 = smov 128  }
  0x12   : > { %s619_s30 = smov 8   ;;  %p134_p12 = pnand %p460_p10, %p133_p11 }
  0x13   : > { %475 = dma.hbm_to_vmem [thread:$0]  (!%p473_p9), %s124_s25, 1024, %s126_s27, %s110_s28, %s618_s29, %s618_s29, %s619_s30  }
  0x14   : > { %137 = sbr.rel (%p134_p12) target bundleno = 135 (0x87), region = 24  ;;  %s139_s2 = sand.u32 (!%p134_p12), 1, %s600_s7  }
  0x15   : > { %s461_s3 = sshll.u32 (!%p134_p12), %s139_s2, 6  ;;  %s140_s4 = scalar_lea.sflag (!%p134_p12), [#allocation6], %s139_s2 }
  0x16   : > { %s143_s5 = scalar_lea.vmem (!%p134_p12), [#allocation5], %s461_s3 }
  0x19   : > { %591 = dma.done.wait (%p676_p7), %s140_s4, 1024  }
  0x1a   : > { %593 = vsyncadd (%p676_p7), %s140_s4, 4294966272  ;;  %v620_v0 = vmov 32.0   ;;  %v621_v1 = vmov 0.0   ;;  %v622_v2 = vmov -inf   ;;  %v698_v4 = vld [vmem:[%s143_s5] sm:$0xff]  ;;  %v700_v5 = vld [vmem:[%s143_s5 + $0x8] sm:$0xff] }
  0x1b   : > { %530 = vrcp.f32 %v620_v0  ;;  %181 = vst [vmem:[#allocation2] sm:$0x1] %v621_v1  ;;  %v189_v6 = vld [vmem:[%s143_s5 + $0x10] sm:$0xff]  ;;  %v191_v8 = vld [vmem:[%s143_s5 + $0x20] sm:$0xff]  ;;  %v192_v9 = vld [vmem:[%s143_s5 + $0x28] sm:$0xff]  ;;  %v195_v10 = vadd.f32 %v700_v5, %v698_v4  ;;  %s462_s6 = sshll.u32 %s608_s9, 1 }
  0x1c   : > { %182 = vst [vmem:[#allocation2 + $0x1] sm:$0x1] %v621_v1  ;;  %v190_v11 = vld [vmem:[%s143_s5 + $0x18] sm:$0xff]  ;;  %v193_v12 = vld [vmem:[%s143_s5 + $0x30] sm:$0xff]  ;;  %v204_v13 = vadd.f32 %v192_v9, %v191_v8  ;;  %v294_v59 = vmax.f32 %v698_v4, %v189_v6  ;;  %p169_p13 = scmp.lt.s32.totalorder %s462_s6, 3 }
  0x1d   : > { %183 = vst [vmem:[#allocation3] sm:$0x1] %v621_v1  ;;  %v194_v15 = vld [vmem:[%s143_s5 + $0x38] sm:$0xff]  ;;  %v196_v16 = vadd.f32 %v195_v10, %v189_v6  ;;  %v295_v60 = vmax.f32 %v700_v5, %v190_v11  ;;  %v303_v61 = vmax.f32 %v191_v8, %v193_v12 }
  0x1e   : > { %184 = vst [vmem:[#allocation3 + $0x1] sm:$0x1] %v621_v1  ;;  %v205_v17 = vadd.f32 %v204_v13, %v193_v12  ;;  %v304_v0 = vmax.f32 %v192_v9, %v194_v15  ;;  %s750_s6 = smov (!%p169_p13, %s462_s6), 3 }
  0x1f   : > { %185 = vst [vmem:[#allocation4] sm:$0x1] %v622_v2  ;;  %v197_v19 = vadd.f32 %v196_v16, %v190_v11  ;;  %v296_v1 = vmax.f32 %v294_v59, %v295_v60  ;;  %s463_s9 = sshll.u32 %s750_s6, 2 }
  0x20   : > { %186 = vst [vmem:[#allocation4 + $0x1] sm:$0x1] %v622_v2  ;;  %v206_v20 = vadd.f32 %v205_v17, %v194_v15  ;;  %v305_v2 = vmax.f32 %v303_v61, %v304_v0  ;;  %s712_s19 = scalar_lea.vmem %s739_s1, %s463_s9 }
  0x21   : > { %v531_v3 = vpop.eup %530  ;;  %v198_v22 = vrot.slane %v197_v19, 4 }
  0x22   : > { %v254_v7 = vmul.f32 32.0, %v531_v3  ;;  %vm259_vm0 = vweird.f32 %v531_v3  ;;  %v207_v23 = vrot.slane %v206_v20, 4  ;;  %v306_v13 = vrot.slane %v305_v2, 4 }
  0x23   : > { %v199_v25 = vadd.f32 %v198_v22, %v197_v19 }
  0x24   : > { %v255_v14 = vsub.f32 1.0, %v254_v7  ;;  %v208_v26 = vadd.f32 %v207_v23, %v206_v20  ;;  %v307_v16 = vmax.f32 %v305_v2, %v306_v13  ;;  %v269_v23 = vld [vmem:[#allocation2] sm:$0x1] }
  0x25   : > { %v200_v27 = vrot.slane %v199_v25, 2 }
  0x26   : > { %v256_v18 = vmul.f32 %v531_v3, %v255_v14  ;;  %v209_v28 = vrot.slane %v208_v26, 2  ;;  %v308_v20 = vrot.slane %v307_v16, 2 }
  0x27   : > { %v201_v29 = vadd.f32 %v200_v27, %v199_v25 }
  0x28   : > { %v257_v21 = vadd.f32 %v531_v3, %v256_v18  ;;  %v210_v30 = vadd.f32 %v209_v28, %v208_v26 }
  0x29   : > { %v202_v31 = vrot.slane %v201_v29, 1 }
  0x2a   : > { %v261_v24 = vsel %vm259_vm0, %v531_v3, %v257_v21  ;;  %v211_v32 = vrot.slane %v210_v30, 1  ;;  %v297_v3 = vrot.slane %v296_v1, 4 }
  0x2b   : > { %468 = vpush %v261_v24  ;;  %v203_v33 = vadd.f32 %v202_v31, %v201_v29  ;;  %v270_v24 = vld [vmem:[#allocation2 + $0x1] sm:$0x1] }
  0x2c   : > { %v212_v34 = vadd.f32 %v211_v32, %v210_v30  ;;  %v298_v14 = vmax.f32 %v296_v1, %v297_v3 }
  0x2d   : > { %v213_v35 = vmul.f32 0.03125, %v203_v33  ;;  %v280_v33 = vld [vmem:[#allocation3] sm:$0x1] }
  0x2e   : > { %v214_v36 = vmul.f32 0.03125, %v212_v34  ;;  %v299_v17 = vrot.slane %v298_v14, 2  ;;  %v281_v34 = vld [vmem:[#allocation3 + $0x1] sm:$0x1] }
  0x2f   : > { %v215_v37 = vsub.f32 %v698_v4, %v213_v35  ;;  %v216_v38 = vsub.f32 %v700_v5, %v213_v35  ;;  %v217_v41 = vsub.f32 %v189_v6, %v213_v35  ;;  %v218_v47 = vsub.f32 %v190_v11, %v213_v35 }
  0x30   : > { %v219_v39 = vsub.f32 %v191_v8, %v214_v36  ;;  %v220_v40 = vsub.f32 %v192_v9, %v214_v36  ;;  %v221_v42 = vsub.f32 %v193_v12, %v214_v36  ;;  %v222_v48 = vsub.f32 %v194_v15, %v214_v36  ;;  %v312_v9 = vld [vmem:[#allocation4] sm:$0x1]  ;;  %v313_v15 = vld [vmem:[#allocation4 + $0x1] sm:$0x1] }
  0x31   : > { %v223_v43 = vmul.f32 %v215_v37, %v215_v37  ;;  %v224_v44 = vmul.f32 %v216_v38, %v216_v38  ;;  %v225_v49 = vmul.f32 %v217_v41, %v217_v41  ;;  %v226_v53 = vmul.f32 %v218_v47, %v218_v47 }
  0x32   : > { %v227_v45 = vmul.f32 %v219_v39, %v219_v39  ;;  %v228_v46 = vmul.f32 %v220_v40, %v220_v40  ;;  %v229_v50 = vmul.f32 %v221_v42, %v221_v42  ;;  %v230_v54 = vmul.f32 %v222_v48, %v222_v48 }
  0x33   : > { %v231_v51 = vadd.f32 %v224_v44, %v223_v43  ;;  %v300_v21 = vmax.f32 %v298_v14, %v299_v17  ;;  %v309_v4 = vmax.f32 %v307_v16, %v308_v20  ;;  %v271_v29 = vsub.f32 %v213_v35, %v269_v23 }
  0x34   : > { %v240_v52 = vadd.f32 %v228_v46, %v227_v45  ;;  %v272_v30 = vsub.f32 %v214_v36, %v270_v24 }
  0x35   : > { %v232_v55 = vadd.f32 %v231_v51, %v225_v49  ;;  %v301_v5 = vrot.slane %v300_v21, 1  ;;  %v310_v11 = vrot.slane %v309_v4, 1  ;;  %v284_v37 = vmul.f32 %v271_v29, %v271_v29 }
  0x36   : > { %v241_v56 = vadd.f32 %v240_v52, %v229_v50  ;;  %v285_v38 = vmul.f32 %v272_v30, %v272_v30 }
  0x37   : > { %v233_v57 = vadd.f32 %v232_v55, %v226_v53  ;;  %v302_v12 = vmax.f32 %v300_v21, %v301_v5  ;;  %v311_v22 = vmax.f32 %v309_v4, %v310_v11 }
  0x38   : > { %v242_v58 = vadd.f32 %v241_v56, %v230_v54 }
  0x39   : > { %v234_v62 = vrot.slane %v233_v57, 4  ;;  %v314_v25 = vmax.f32 %v312_v9, %v302_v12  ;;  %v315_v28 = vmax.f32 %v313_v15, %v311_v22 }
  0x3a   : > { %v243_v63 = vrot.slane %v242_v58, 4 }
  0x3b   : > { %v235_v7 = vadd.f32 %v234_v62, %v233_v57  ;;  %316 = vst [vmem:[#allocation4] sm:$0x1] %v314_v25 }
  0x3c   : > { %v244_v10 = vadd.f32 %v243_v63, %v242_v58  ;;  %317 = vst [vmem:[#allocation4 + $0x1] sm:$0x1] %v315_v28 }
  0x3d   : > { %v236_v18 = vrot.slane %v235_v7, 2 }
  0x3e   : > { %v245_v19 = vrot.slane %v244_v10, 2 }
  0x3f   : > { %v237_v6 = vadd.f32 %v236_v18, %v235_v7 }
  0x40   : > { %v246_v8 = vadd.f32 %v245_v19, %v244_v10 }
  0x41   : > { %v238_v26 = vrot.slane %v237_v6, 1 }
  0x42   : > { %v247_v27 = vrot.slane %v246_v8, 1  ;;  %v355_v49 = vld [vmem:[#allocation4] sm:$0x1] }
  0x43   : > { %v239_v31 = vadd.f32 %v238_v26, %v237_v6  ;;  %v356_v50 = vld [vmem:[#allocation4 + $0x1] sm:$0x1]  ;;  %357 = vst [vmem:[%s712_s19 + $0x2] sm:$0x1] %v355_v49 }
  0x44   : > { %v248_v32 = vadd.f32 %v247_v27, %v246_v8  ;;  %358 = vst [vmem:[%s712_s19 + $0x6] sm:$0x1] %v356_v50 }
  0x45   : > { %v282_v42 = vadd.f32 %v280_v33, %v239_v31 }
  0x46   : > { %v283_v43 = vadd.f32 %v281_v34, %v248_v32 }
  0x5c   : > { %s469_s12 = spop %468 }
  0x5d   : > { %s268_s14 = smul.f32 32.0, %s469_s12 }
  0x5f   : > { %v273_v39 = vstv %s268_s14  ;;  %s286_s15 = smul.f32 0.0, %s268_s14 }
  0x60   : > { %v274_v40 = vmul.f32 %v273_v39, %v271_v29  ;;  %v275_v41 = vmul.f32 %v273_v39, %v272_v30 }
  0x61   : > { %v287_v44 = vstv %s286_s15 }
  0x62   : > { %v276_v35 = vadd.f32 %v274_v40, %v269_v23  ;;  %v277_v36 = vadd.f32 %v275_v41, %v270_v24  ;;  %v288_v45 = vmul.f32 %v287_v44, %v284_v37  ;;  %v289_v46 = vmul.f32 %v287_v44, %v285_v38 }
  0x64   : > { %278 = vst [vmem:[#allocation2] sm:$0x1] %v276_v35  ;;  %v290_v47 = vadd.f32 %v288_v45, %v282_v42  ;;  %v291_v48 = vadd.f32 %v289_v46, %v283_v43 }
  0x65   : > { %279 = vst [vmem:[#allocation2 + $0x1] sm:$0x1] %v277_v36 }
  0x66   : > { %292 = vst [vmem:[#allocation3] sm:$0x1] %v290_v47 }
  0x67   : > { %293 = vst [vmem:[#allocation3 + $0x1] sm:$0x1] %v291_v48 }
  0x6b   : > { %v321_v51 = vld [vmem:[#allocation2] sm:$0x1] }
  0x6c   : > { %v322_v52 = vld [vmem:[#allocation2 + $0x1] sm:$0x1]  ;;  %323 = vst [vmem:[%s712_s19] sm:$0x1] %v321_v51 }
  0x6d   : > { %324 = vst [vmem:[%s712_s19 + $0x4] sm:$0x1] %v322_v52  ;;  %v325_v53 = vld [vmem:[#allocation3] sm:$0x1] }
  0x6e   : > { %v326_v54 = vld [vmem:[#allocation3 + $0x1] sm:$0x1]  ;;  %v327_v55 = vmul.f32 0.032258064, %v325_v53 }
  0x6f   : > { %v328_v56 = vmul.f32 0.032258064, %v326_v54 }
  0x70   : > { %532 = vrsqrt.f32 %v327_v55  ;;  %vm336_vm1 = vcmp.eq.f32.partialorder %v327_v55, inf  ;;  %v339_v13 = vand.u32 2147483648, %v327_v55  ;;  %vm338_vm2 = vcmp.eq.f32.partialorder %v327_v55, 0.0 }
  0x71   : > { %534 = vrsqrt.f32 %v328_v56  ;;  %vm348_vm3 = vcmp.eq.f32.partialorder %v328_v56, inf  ;;  %v351_v17 = vand.u32 2147483648, %v328_v56  ;;  %vm350_vm4 = vcmp.eq.f32.partialorder %v328_v56, 0.0 }
  0x76   : > { %v533_v57 = vpop.eup %532 }
  0x77   : > { %v535_v58 = vpop.eup %534  ;;  %v330_v59 = vmul.f32 %v533_v57, %v327_v55 }
  0x78   : > { %v342_v60 = vmul.f32 %v535_v58, %v328_v56 }
  0x79   : > { %v331_v61 = vmul.f32 %v533_v57, %v330_v59 }
  0x7a   : > { %v343_v62 = vmul.f32 %v535_v58, %v342_v60 }
  0x7b   : > { %v332_v63 = vmul.f32 0.5, %v331_v61 }
  0x7c   : > { %v344_v0 = vmul.f32 0.5, %v343_v62 }
  0x7d   : > { %v333_v1 = vsub.f32 1.5, %v332_v63 }
  0x7e   : > { %v345_v2 = vsub.f32 1.5, %v344_v0 }
  0x7f   : > { %v334_v3 = vmul.f32 %v533_v57, %v333_v1 }
  0x80   : > { %v346_v7 = vmul.f32 %v535_v58, %v345_v2 }
  0x81   : > { %v335_v10 = vmul.f32 %v334_v3, %v327_v55 }
  0x82   : > { %v347_v14 = vmul.f32 %v346_v7, %v328_v56 }
  0x83   : > { %v337_v16 = vsel %vm336_vm1, %v327_v55, %v335_v10 }
  0x84   : > { %v340_v18 = vsel %vm338_vm2, %v339_v13, %v337_v16  ;;  %v349_v19 = vsel %vm348_vm3, %v328_v56, %v347_v14 }
  0x85   : > { %v352_v20 = vsel %vm350_vm4, %v351_v17, %v349_v19  ;;  %353 = vst [vmem:[%s712_s19 + $0x1] sm:$0x1] %v340_v18 }
  0x86   : > { %354 = vst [vmem:[%s712_s19 + $0x5] sm:$0x1] %v352_v20 }
  0x87 PF: > { %s14_s11 = sadd.s32 1, %s616_s11   ;;  %s742_s6 = smov %s600_s7 }
  0x88   : > { %p11_p0 = scmp.ge.s32.totalorder %s14_s11, 4   ;;  %s743_s7 = smov %s604_s8 }
  0x89   : > { %s744_s8 = smov %s682_s18  ;;  %s745_s9 = smov %s612_s10 }
  0x8a   : > { %s746_s10 = smov %s748_s13  ;;  %13 = sbr.rel (!%p11_p0) target bundleno = 4 (0x4), region = 72 }
  0x8f   :  { %387 = vsyncpa [#allocation6], 1 }
  0x90   :  { %389 = vsyncpa [#allocation6 + $0x1], 1 }

</bundles_post_ra>
